<compile_context>
chip_gen: v6e
topology: v6e:2x2x1
jax: 0.10.0
libtpu: 0.0.40
codegen_flags: <defaults>
</compile_context>

<pallas_src>
import functools

import jax
import jax.numpy as jnp
from jax import lax
from jax.experimental import pallas as pl
from jax.experimental.pallas import tpu as pltpu


# ---------------------------------------------------------------------------
# Pallas kernel
# ---------------------------------------------------------------------------
def _dilconv_attention_kernel(x_ref, kmax_ref, kmean_ref, bias_ref, o_ref, *,
                              inv_c):
    """Fused ChannelPool -> folded dilated-conv/1x1-conv/BN -> sigmoid -> rescale.

    x_ref    : (BB, C, HW)   input block (native dtype, no full-tile f32 cast)
    kmax_ref : (HW, HW) f32  folded linear operator acting on the max-pooled map
    kmean_ref: (HW, HW) f32  folded linear operator acting on the mean-pooled map
    bias_ref : (1, HW)  f32  folded conv/BN bias
    o_ref    : (BB, C, HW)   output block
    """
    x = x_ref[...]

    # ChannelPool: max and mean over the channel (sublane) axis, f32 accumulation.
    ch_max = jnp.max(x, axis=1).astype(jnp.float32)            # (BB, HW)
    ch_mean = jnp.sum(x, axis=1, dtype=jnp.float32) * inv_c    # (BB, HW)

    # Dilated conv + 1x1 conv + (eval-mode) BatchNorm as two small MXU matmuls.
    acc = jnp.dot(ch_max, kmax_ref[...], preferred_element_type=jnp.float32)
    acc = acc + jnp.dot(ch_mean, kmean_ref[...],
                        preferred_element_type=jnp.float32)
    acc = acc + bias_ref[...]                                  # (BB, HW), f32

    scale = jax.nn.sigmoid(acc)                                # f32 gate

    # Rescale x, broadcasting the per-pixel gate over the channel axis.
    o_ref[...] = x * scale.astype(o_ref.dtype)[:, None, :]


# ---------------------------------------------------------------------------
# Wrapper helpers
# ---------------------------------------------------------------------------
def _choose_batch_block(batch, per_elem_bytes, target_bytes=4 * 1024 * 1024):
    """Largest divisor of `batch` whose block stays under target_bytes, while
    keeping >= 2 grid steps when possible (so both v7x TensorCores get work)."""
    divisors = [d for d in range(1, batch + 1) if batch % d == 0]
    fitting = [d for d in divisors if d * per_elem_bytes <= target_bytes] or [1]
    bb = max(fitting)
    if batch // bb < 2:
        two_step = [d for d in fitting if batch // d >= 2]
        if two_step:
            bb = max(two_step)
    return bb


def _build_gate_operators(conv1_w, conv2_w, bn_gamma, bn_beta, bn_mean, bn_var,
                          H, W, padding, dilation, eps):
    """Fold (dilated conv -> 1x1 conv -> eval-mode BN) into two (HW, HW) linear
    operators (one per pooled map) plus a bias row.  Weight-only preprocessing;
    never touches the activations.

    # TODO(synk): for large spatial sizes the (HW, HW) folded operator no longer
    # fits VMEM; switch to an in-kernel shifted-slice stencil for the conv.
    """
    k = conv1_w.shape[-1]
    HW = H * W

    inv_std = 1.0 / jnp.sqrt(bn_var.reshape(()) + eps)
    gain = (bn_gamma.reshape(()) * conv2_w.reshape(()) * inv_std).astype(jnp.float32)
    bias = (bn_beta.reshape(()) -
            bn_gamma.reshape(()) * bn_mean.reshape(()) * inv_std).astype(jnp.float32)
    w_eff = conv1_w.astype(jnp.float32) * gain                 # (1, 2, k, k)

    ii = jnp.arange(H)[:, None]                                # (H, 1)
    jj = jnp.arange(W)[None, :]                                # (1, W)
    out_flat = (ii * W + jj).reshape(-1)                       # (HW,)

    kmax_t = jnp.zeros((HW, HW), jnp.float32)
    kmean_t = jnp.zeros((HW, HW), jnp.float32)
    for a in range(k):
        for b in range(k):
            di = a * dilation - padding
            dj = b * dilation - padding
            si = ii + di
            sj = jj + dj
            valid = ((si >= 0) & (si < H) & (sj >= 0) & (sj < W)).reshape(-1)
            in_flat = (jnp.clip(si, 0, H - 1) * W +
                       jnp.clip(sj, 0, W - 1)).reshape(-1)
            kmax_t = kmax_t.at[in_flat, out_flat].add(
                jnp.where(valid, w_eff[0, 0, a, b], 0.0))
            kmean_t = kmean_t.at[in_flat, out_flat].add(
                jnp.where(valid, w_eff[0, 1, a, b], 0.0))

    bias_row = jnp.full((1, HW), bias, jnp.float32)
    return kmax_t, kmean_t, bias_row


# ---------------------------------------------------------------------------
# Forward
# ---------------------------------------------------------------------------
@functools.partial(jax.jit,
                   static_argnames=("stride", "padding", "dilation", "eps"))
def dilconv_attention_forward(x, conv1_w, conv2_w, bn_gamma, bn_beta, bn_mean,
                              bn_var, *, stride, padding, dilation, eps=1e-5):
    """DilConvAttention forward.  x: (B, C, H, W)."""
    B, C, H, W = x.shape
    k = conv1_w.shape[-1]
    HW = H * W
    assert conv1_w.shape == (1, 2, k, k)
    assert stride == 1, "stride must be 1 so the gate matches x spatially"
    assert 2 * padding == dilation * (k - 1), (
        "padding/dilation must give a 'same'-size conv output")

    # TODO(synk): BatchNorm2d is applied in eval mode (running statistics);
    # training-mode batch-statistic computation is not fused into the kernel.
    kmax_t, kmean_t, bias_row = _build_gate_operators(
        conv1_w, conv2_w, bn_gamma, bn_beta, bn_mean, bn_var,
        H, W, padding, dilation, eps)

    x_flat = x.reshape(B, C, HW)
    itemsize = jnp.dtype(x.dtype).itemsize
    BB = _choose_batch_block(B, C * HW * itemsize)
    grid = (B // BB,)

    kernel = functools.partial(_dilconv_attention_kernel, inv_c=1.0 / C)

    cost = pl.CostEstimate(
        flops=int(3 * B * C * HW + 2 * 2 * B * HW * HW),
        transcendentals=int(B * HW),
        bytes_accessed=int(2 * B * C * HW * itemsize + 2 * HW * HW * 4),
    )

    out = pl.pallas_call(
        kernel,
        out_shape=jax.ShapeDtypeStruct((B, C, HW), x.dtype),
        grid_spec=pltpu.PrefetchScalarGridSpec(
            num_scalar_prefetch=0,
            grid=grid,
            in_specs=[
                pl.BlockSpec((BB, C, HW), lambda i: (i, 0, 0)),
                pl.BlockSpec((HW, HW), lambda i: (0, 0)),
                pl.BlockSpec((HW, HW), lambda i: (0, 0)),
                pl.BlockSpec((1, HW), lambda i: (0, 0)),
            ],
            out_specs=pl.BlockSpec((BB, C, HW), lambda i: (i, 0, 0)),
        ),
        compiler_params=pltpu.CompilerParams(
            dimension_semantics=("parallel",),
            vmem_limit_bytes=32 * 1024 * 1024,
        ),
        cost_estimate=cost,
    )(x_flat, kmax_t, kmean_t, bias_row)

    return out.reshape(B, C, H, W)


# ---------------------------------------------------------------------------
# Pure-JAX reference (matches the PyTorch forward, eval-mode BN)
# ---------------------------------------------------------------------------
def dilconv_attention_reference(x, conv1_w, conv2_w, bn_gamma, bn_beta,
                                bn_mean, bn_var, *, stride, padding, dilation,
                                eps=1e-5):
    ch_max = jnp.max(x, axis=1, keepdims=True)
    ch_mean = jnp.mean(x, axis=1, keepdims=True)
    pooled = jnp.concatenate([ch_max, ch_mean], axis=1)          # (B, 2, H, W)
    y = lax.conv_general_dilated(
        pooled, conv1_w, window_strides=(stride, stride),
        padding=[(padding, padding), (padding, padding)],
        rhs_dilation=(dilation, dilation),
        dimension_numbers=("NCHW", "OIHW", "NCHW"))              # (B, 1, H, W)
    y = y * conv2_w.reshape(())                                  # 1x1 conv, 1 ch
    inv_std = 1.0 / jnp.sqrt(bn_var.reshape(()) + eps)
    y = (y - bn_mean.reshape(())) * inv_std * bn_gamma.reshape(()) \
        + bn_beta.reshape(())
    return x * jax.nn.sigmoid(y)


if __name__ == "__main__":
    B, C, H, W = 2, 16, 16, 16
    kernel_size, stride, padding, dilation = 3, 1, 2, 2   # 'same' dilated conv

    key = jax.random.PRNGKey(0)
    kx, k1, k2, kg, kb = jax.random.split(key, 5)

    x = jax.random.normal(kx, (B, C, H, W), dtype=jnp.float32)
    conv1_w = 0.3 * jax.random.normal(
        k1, (1, 2, kernel_size, kernel_size), jnp.float32)       # Conv2d(2,1,k)
    conv2_w = jax.random.normal(k2, (1, 1, 1, 1), jnp.float32)   # Conv2d(1,1,1)
    bn_gamma = 1.0 + 0.1 * jax.random.normal(kg, (1,), jnp.float32)
    bn_beta = 0.1 * jax.random.normal(kb, (1,), jnp.float32)
    bn_mean = jnp.zeros((1,), jnp.float32)   # fresh BatchNorm2d running stats
    bn_var = jnp.ones((1,), jnp.float32)

    out = dilconv_attention_forward(
        x, conv1_w, conv2_w, bn_gamma, bn_beta, bn_mean, bn_var,
        stride=stride, padding=padding, dilation=dilation)
    out = jax.block_until_ready(out)

    ref = dilconv_attention_reference(
        x, conv1_w, conv2_w, bn_gamma, bn_beta, bn_mean, bn_var,
        stride=stride, padding=padding, dilation=dilation)

    assert out.shape == (B, C, H, W)
    assert jnp.allclose(out, ref, atol=1e-4, rtol=1e-4), "mismatch vs reference"
    print("KERNEL_OK")
</pallas_src>

<mosaic_0001>
module attributes {stable_mosaic.version = 11 : i64} {
  func.func private @main(%arg0: i32) attributes {dimension_semantics = [#tpu.dimension_semantics<core_parallel>], iteration_bounds = array<i64: 2>, tpu.core_type = #tpu.core_type<sc_scalar_subcore>, window_params = []} {
    return
  }
}

module attributes {stable_mosaic.version = 11 : i64} {
  func.func private @main(%arg0: i32) attributes {dimension_semantics = [#tpu.dimension_semantics<core_parallel>], iteration_bounds = array<i64: 2>, tpu.core_type = #tpu.core_type<sc_scalar_subcore>, window_params = []} {
    return
  }
}

module attributes {stable_mosaic.version = 11 : i64} {
  func.func @_dilconv_attention_kernel(%arg0: i32, %arg1: memref<1x16x256xf32, #tpu.memory_space<vmem>>, %arg2: memref<256x256xf32, #tpu.memory_space<vmem>>, %arg3: memref<256x256xf32, #tpu.memory_space<vmem>>, %arg4: memref<1x256xf32, #tpu.memory_space<vmem>>, %arg5: memref<1x16x256xf32, #tpu.memory_space<vmem>>) attributes {dimension_semantics = [#tpu.dimension_semantics<parallel>], iteration_bounds = array<i64: 2>, scalar_prefetch = 0 : i64, scratch_operands = 0 : i64, tpu.core_type = #tpu.core_type<tc>, window_params = [{transform_indices = @transform_0, window_bounds = array<i64: 1, 16, 256>}, {pipeline_mode = #tpu.pipeline_mode<synchronous>, transform_indices = @transform_1, window_bounds = array<i64: 256, 256>}, {pipeline_mode = #tpu.pipeline_mode<synchronous>, transform_indices = @transform_2, window_bounds = array<i64: 256, 256>}, {pipeline_mode = #tpu.pipeline_mode<synchronous>, transform_indices = @transform_3, window_bounds = array<i64: 1, 256>}, {transform_indices = @transform_4, window_bounds = array<i64: 1, 16, 256>}]} {
    %c0 = arith.constant 0 : index
    %c0_0 = arith.constant 0 : index
    %c0_1 = arith.constant 0 : index
    %0 = vector.load %arg1[%c0, %c0_0, %c0_1] : memref<1x16x256xf32, #tpu.memory_space<vmem>>, vector<1x16x256xf32>
    %cst = arith.constant dense<0xFF800000> : vector<1x256xf32>
    %1 = vector.multi_reduction <maximumf>, %0, %cst [1] : vector<1x16x256xf32> to vector<1x256xf32>
    %cst_2 = arith.constant dense<0.000000e+00> : vector<1x256xf32>
    %2 = vector.multi_reduction <add>, %0, %cst_2 [1] : vector<1x16x256xf32> to vector<1x256xf32>
    %cst_3 = arith.constant 6.250000e-02 : f32
    %3 = vector.broadcast %cst_3 : f32 to vector<1x256xf32>
    %4 = arith.mulf %2, %3 : vector<1x256xf32>
    %c0_4 = arith.constant 0 : index
    %c0_5 = arith.constant 0 : index
    %5 = vector.load %arg2[%c0_4, %c0_5] : memref<256x256xf32, #tpu.memory_space<vmem>>, vector<256x256xf32>
    %cst_6 = arith.constant dense<0.000000e+00> : vector<1x256xf32>
    %6 = tpu.matmul %1, %5, %cst_6 {dimension_numbers = #tpu.dot_dimension_numbers<[1], [0], [0], [1], [0, 0, 1, 1], [], []>} : vector<1x256xf32>, vector<256x256xf32>, vector<1x256xf32> -> vector<1x256xf32>
    %c0_7 = arith.constant 0 : index
    %c0_8 = arith.constant 0 : index
    %7 = vector.load %arg3[%c0_7, %c0_8] : memref<256x256xf32, #tpu.memory_space<vmem>>, vector<256x256xf32>
    %cst_9 = arith.constant dense<0.000000e+00> : vector<1x256xf32>
    %8 = tpu.matmul %4, %7, %cst_9 {dimension_numbers = #tpu.dot_dimension_numbers<[1], [0], [0], [1], [0, 0, 1, 1], [], []>} : vector<1x256xf32>, vector<256x256xf32>, vector<1x256xf32> -> vector<1x256xf32>
    %9 = arith.addf %6, %8 : vector<1x256xf32>
    %c0_10 = arith.constant 0 : index
    %c0_11 = arith.constant 0 : index
    %10 = vector.load %arg4[%c0_10, %c0_11] : memref<1x256xf32, #tpu.memory_space<vmem>>, vector<1x256xf32>
    %11 = arith.addf %9, %10 : vector<1x256xf32>
    %12 = arith.negf %11 : vector<1x256xf32>
    %13 = math.exp %12 : vector<1x256xf32>
    %cst_12 = arith.constant 1.000000e+00 : f32
    %14 = vector.broadcast %cst_12 : f32 to vector<1x256xf32>
    %15 = arith.addf %14, %13 : vector<1x256xf32>
    %16 = arith.divf %14, %15 : vector<1x256xf32>
    %17 = vector.shape_cast %16 : vector<1x256xf32> to vector<1x1x256xf32>
    %18 = vector.broadcast %17 : vector<1x1x256xf32> to vector<1x16x256xf32>
    %19 = arith.mulf %0, %18 : vector<1x16x256xf32>
    %c0_13 = arith.constant 0 : index
    %c0_14 = arith.constant 0 : index
    %c0_15 = arith.constant 0 : index
    %20 = vector.load %arg5[%c0_13, %c0_14, %c0_15] : memref<1x16x256xf32, #tpu.memory_space<vmem>>, vector<1x16x256xf32>
    tpu.vector_store %arg5[%c0_13, %c0_14, %c0_15], %19 {strides = array<i32>} : memref<1x16x256xf32, #tpu.memory_space<vmem>>, vector<1x16x256xf32>,
    return
  }
  func.func @transform_0(%arg0: i32) -> (i32, i32, i32) {
    %c0_i32 = arith.constant 0 : i32
    %c0_i32_0 = arith.constant 0 : i32
    %c0_i32_1 = arith.constant 0 : i32
    return %arg0, %c0_i32, %c0_i32_0 : i32, i32, i32
  }
  func.func @transform_1(%arg0: i32) -> (i32, i32) {
    %c0_i32 = arith.constant 0 : i32
    %c0_i32_0 = arith.constant 0 : i32
    %c0_i32_1 = arith.constant 0 : i32
    return %c0_i32, %c0_i32_0 : i32, i32
  }
  func.func @transform_2(%arg0: i32) -> (i32, i32) {
    %c0_i32 = arith.constant 0 : i32
    %c0_i32_0 = arith.constant 0 : i32
    %c0_i32_1 = arith.constant 0 : i32
    return %c0_i32, %c0_i32_0 : i32, i32
  }
  func.func @transform_3(%arg0: i32) -> (i32, i32) {
    %c0_i32 = arith.constant 0 : i32
    %c0_i32_0 = arith.constant 0 : i32
    %c0_i32_1 = arith.constant 0 : i32
    return %c0_i32, %c0_i32_0 : i32, i32
  }
  func.func @transform_4(%arg0: i32) -> (i32, i32, i32) {
    %c0_i32 = arith.constant 0 : i32
    %c0_i32_0 = arith.constant 0 : i32
    %c0_i32_1 = arith.constant 0 : i32
    return %arg0, %c0_i32, %c0_i32_0 : i32, i32, i32
  }
}

</mosaic_0001>

<bundles_post_ra>
// kernel: dilconv_attention_forward.1
= control target key start
LH: loop header
LB: loop body
LE: loop exit
PB: predicated region body
PF: predicated region fallthrough
CT: control target
= control target key end

     0   :  { %9 = vsyncpa [#allocation3], 0  ;;  %s738_s15 = smov 0   ;;  %s1001_s0 = inlined_call_operand.vmem [shape: f32[2,16,256], index: 0, kind: input, shape index: {}]   ;;  %s1002_s1 = inlined_call_operand.hbm [shape: f32[256,256], index: 1, kind: input, shape index: {}]   ;;  %s1003_s2 = inlined_call_operand.vmem [shape: f32[256,256], index: 2, kind: input, shape index: {}]   ;;  %s1004_s3 = inlined_call_operand.vmem [shape: f32[1,256], index: 3, kind: input, shape index: {}]   ;;  %s1005_s4 = inlined_call_operand.vmem [shape: f32[2,16,256], index: 4, kind: output, shape index: {}]  }
   0x1 LB: > { %s744_s16 = sadd.s32 4294967295, %s708_s15   ;;  %p628_p0 = scmp.ge.s32.totalorder %s708_s15, 1  ;;  %s708_s15 = sphi %s738_s15, %s15_s15  }
   0x2   : > { %p135_p1 = scmp.lt.s32.totalorder %s708_s15, 3  ;;  %s710_s17 = smov [#allocation2]  }
   0x3   : > { %s147_s18 = sshll.u32 %s710_s17, 4  ;;  %p651_p3 = scmp.eq.s32.totalorder %s744_s16, 0  ;;  %s148_s18 = int_to_ptr.vmem [resolvable:$true] %s147_s18 }
   0x4   : > { %p748_p2 = pnand %p628_p0, %p135_p1  ;;  %s683_s20 = scalar_lea.vmem %s148_s18, 8192 }
   0x5   : > { %p684_p7 = scmp.ne.s32.totalorder %s148_s18, %s683_s20  ;;  %p691_p10 = scmp.lt.s32.totalorder %s148_s18, %s148_s18 }
   0x6   : > { %p647_p4 = pneg %p748_p2  ;;  %p692_p11 = scmp.lt.s32.totalorder %s683_s20, %s683_s20 }
   0x8   : > { %p648_p5 = pnand %p651_p3, %p647_p4  ;;  %p693_p12 = por %p692_p11, %p691_p10 }
   0xa   : > { %p674_p6 = pneg %p648_p5 }
   0xc   : > { %p686_p8 = pnand %p684_p7, %p674_p6 }
   0xe   : > { %p687_p9 = pneg %p686_p8 }
  0x10   : > { %p694_p13 = pnand %p693_p12, %p687_p9 }
  0x12   : > { %697 = shalt.err (!%p694_p13)
}
  0x13   : > { %s711_s21 = smov 256   ;;  %s712_s22 = smov 16  }
  0x14   : > { %650 = dma.hbm_to_vmem [thread:$0]  (!%p648_p5), %s1002_s1, 8192, %s148_s18, [#allocation3], %s711_s21, %s711_s21, %s712_s22  }
  0x15   : > { %177 = sbr.rel (%p748_p2) target bundleno = 330 (0x14a), region = 36 }
  0x1a   : > { %703 = dma.done.wait (%p651_p3), [#allocation3], 8192  }
  0x1b   : > { %705 = vsyncadd (%p651_p3), [#allocation3], 4294959104  ;;  %v342_v0 = vld [vmem:[%s1003_s2 + $0xf8] sm:$0xff]  ;;  %v341_v2 = vld [vmem:[%s1003_s2 + $0xf0] sm:$0xff]  ;;  %p203_p0 = scmp.lt.s32.totalorder %s744_s16, 1 }
  0x1c   : > { %v278_v1 = vld [vmem:[#allocation2 + $0xf8] sm:$0xff]  ;;  %375 = vmatprep.subr.mxu0 %v342_v0  ;;  %v277_v3 = vld [vmem:[#allocation2 + $0xf0] sm:$0xff]  ;;  %v340_v4 = vld [vmem:[%s1003_s2 + $0xe8] sm:$0xff] }
  0x1d   : > { %446 = vmatprep.subr.mxu1 %v278_v1  ;;  %v276_v5 = vld [vmem:[#allocation2 + $0xe8] sm:$0xff]  ;;  %376 = vmatpush1.msra.mxu0 %v341_v2  ;;  %v339_v6 = vld [vmem:[%s1003_s2 + $0xe0] sm:$0xff]  ;;  %v338_v8 = vld [vmem:[%s1003_s2 + $0xd8] sm:$0xff]  ;;  %s1008_s16 = smov (!%p203_p0, %s744_s16), 1 }
  0x1e   : > { %447 = vmatpush1.msra.mxu1 %v277_v3  ;;  %v275_v7 = vld [vmem:[#allocation2 + $0xe0] sm:$0xff]  ;;  %377 = vmatprep.subr.mxu0 %v340_v4  ;;  %v274_v9 = vld [vmem:[#allocation2 + $0xd8] sm:$0xff]  ;;  %v337_v10 = vld [vmem:[%s1003_s2 + $0xd0] sm:$0xff]  ;;  %s641_s5 = sshll.u32 %s1008_s16, 5 }
  0x1f   : > { %448 = vmatprep.subr.mxu1 %v276_v5  ;;  %v273_v11 = vld [vmem:[#allocation2 + $0xd0] sm:$0xff]  ;;  %378 = vmatpush1.msra.mxu0 %v339_v6  ;;  %v336_v12 = vld [vmem:[%s1003_s2 + $0xc8] sm:$0xff]  ;;  %v335_v14 = vld [vmem:[%s1003_s2 + $0xc0] sm:$0xff]  ;;  %s207_s14 = scalar_lea.vmem %s1001_s0, %s641_s5  ;;  %s212_s19 = scalar_lea.vmem %s1005_s4, %s641_s5 }
  0x20   : > { %449 = vmatpush1.msra.mxu1 %v275_v7  ;;  %v272_v13 = vld [vmem:[#allocation2 + $0xc8] sm:$0xff]  ;;  %379 = vmatprep.subr.mxu0 %v338_v8  ;;  %v271_v15 = vld [vmem:[#allocation2 + $0xc0] sm:$0xff]  ;;  %v334_v16 = vld [vmem:[%s1003_s2 + $0xb8] sm:$0xff] }
  0x21   : > { %450 = vmatprep.subr.mxu1 %v274_v9  ;;  %380 = vmatpush1.msra.mxu0 %v337_v10  ;;  %v270_v17 = vld [vmem:[#allocation2 + $0xb8] sm:$0xff]  ;;  %v333_v18 = vld [vmem:[%s1003_s2 + $0xb0] sm:$0xff]  ;;  %v332_v20 = vld [vmem:[%s1003_s2 + $0xa8] sm:$0xff] }
  0x22   : > { %451 = vmatpush1.msra.mxu1 %v273_v11  ;;  %381 = vmatprep.subr.mxu0 %v336_v12  ;;  %v269_v19 = vld [vmem:[#allocation2 + $0xb0] sm:$0xff]  ;;  %v268_v21 = vld [vmem:[#allocation2 + $0xa8] sm:$0xff]  ;;  %v331_v22 = vld [vmem:[%s1003_s2 + $0xa0] sm:$0xff] }
  0x23   : > { %452 = vmatprep.subr.mxu1 %v272_v13  ;;  %382 = vmatpush1.msra.mxu0 %v335_v14  ;;  %v267_v23 = vld [vmem:[#allocation2 + $0xa0] sm:$0xff]  ;;  %v330_v24 = vld [vmem:[%s1003_s2 + $0x98] sm:$0xff]  ;;  %v329_v26 = vld [vmem:[%s1003_s2 + $0x90] sm:$0xff] }
  0x24   : > { %453 = vmatpush1.msra.mxu1 %v271_v15  ;;  %383 = vmatprep.subr.mxu0 %v334_v16  ;;  %v266_v25 = vld [vmem:[#allocation2 + $0x98] sm:$0xff]  ;;  %v265_v27 = vld [vmem:[#allocation2 + $0x90] sm:$0xff]  ;;  %v328_v28 = vld [vmem:[%s1003_s2 + $0x88] sm:$0xff] }
  0x25   : > { %454 = vmatprep.subr.mxu1 %v270_v17  ;;  %384 = vmatpush1.msra.mxu0 %v333_v18  ;;  %v264_v29 = vld [vmem:[#allocation2 + $0x88] sm:$0xff]  ;;  %v327_v30 = vld [vmem:[%s1003_s2 + $0x80] sm:$0xff]  ;;  %v326_v32 = vld [vmem:[%s1003_s2 + $0x78] sm:$0xff] }
  0x26   : > { %455 = vmatpush1.msra.mxu1 %v269_v19  ;;  %385 = vmatprep.subr.mxu0 %v332_v20  ;;  %v263_v31 = vld [vmem:[#allocation2 + $0x80] sm:$0xff]  ;;  %v262_v33 = vld [vmem:[#allocation2 + $0x78] sm:$0xff]  ;;  %v325_v34 = vld [vmem:[%s1003_s2 + $0x70] sm:$0xff] }
  0x27   : > { %456 = vmatprep.subr.mxu1 %v268_v21  ;;  %386 = vmatpush1.msra.mxu0 %v331_v22  ;;  %v261_v35 = vld [vmem:[#allocation2 + $0x70] sm:$0xff]  ;;  %v324_v36 = vld [vmem:[%s1003_s2 + $0x68] sm:$0xff]  ;;  %v323_v38 = vld [vmem:[%s1003_s2 + $0x60] sm:$0xff] }
  0x28   : > { %457 = vmatpush1.msra.mxu1 %v267_v23  ;;  %387 = vmatprep.subr.mxu0 %v330_v24  ;;  %v260_v37 = vld [vmem:[#allocation2 + $0x68] sm:$0xff]  ;;  %v259_v39 = vld [vmem:[#allocation2 + $0x60] sm:$0xff]  ;;  %v322_v40 = vld [vmem:[%s1003_s2 + $0x58] sm:$0xff] }
  0x29   : > { %458 = vmatprep.subr.mxu1 %v266_v25  ;;  %388 = vmatpush1.msra.mxu0 %v329_v26  ;;  %v258_v41 = vld [vmem:[#allocation2 + $0x58] sm:$0xff]  ;;  %v321_v42 = vld [vmem:[%s1003_s2 + $0x50] sm:$0xff]  ;;  %v320_v44 = vld [vmem:[%s1003_s2 + $0x48] sm:$0xff] }
  0x2a   : > { %459 = vmatpush1.msra.mxu1 %v265_v27  ;;  %389 = vmatprep.subr.mxu0 %v328_v28  ;;  %v257_v43 = vld [vmem:[#allocation2 + $0x50] sm:$0xff]  ;;  %v256_v45 = vld [vmem:[#allocation2 + $0x48] sm:$0xff]  ;;  %v319_v46 = vld [vmem:[%s1003_s2 + $0x40] sm:$0xff] }
  0x2b   : > { %460 = vmatprep.subr.mxu1 %v264_v29  ;;  %390 = vmatpush1.msra.mxu0 %v327_v30  ;;  %v255_v47 = vld [vmem:[#allocation2 + $0x40] sm:$0xff]  ;;  %v318_v48 = vld [vmem:[%s1003_s2 + $0x38] sm:$0xff]  ;;  %v317_v50 = vld [vmem:[%s1003_s2 + $0x30] sm:$0xff] }
  0x2c   : > { %461 = vmatpush1.msra.mxu1 %v263_v31  ;;  %391 = vmatprep.subr.mxu0 %v326_v32  ;;  %v254_v49 = vld [vmem:[#allocation2 + $0x38] sm:$0xff]  ;;  %v253_v51 = vld [vmem:[#allocation2 + $0x30] sm:$0xff]  ;;  %v316_v52 = vld [vmem:[%s1003_s2 + $0x28] sm:$0xff] }
  0x2d   : > { %462 = vmatprep.subr.mxu1 %v262_v33  ;;  %392 = vmatpush1.msra.mxu0 %v325_v34  ;;  %v252_v53 = vld [vmem:[#allocation2 + $0x28] sm:$0xff]  ;;  %v315_v54 = vld [vmem:[%s1003_s2 + $0x20] sm:$0xff]  ;;  %v314_v56 = vld [vmem:[%s1003_s2 + $0x18] sm:$0xff] }
  0x2e   : > { %463 = vmatpush1.msra.mxu1 %v261_v35  ;;  %393 = vmatprep.subr.mxu0 %v324_v36  ;;  %v251_v55 = vld [vmem:[#allocation2 + $0x20] sm:$0xff]  ;;  %v250_v57 = vld [vmem:[#allocation2 + $0x18] sm:$0xff]  ;;  %v313_v58 = vld [vmem:[%s1003_s2 + $0x10] sm:$0xff] }
  0x2f   : > { %464 = vmatprep.subr.mxu1 %v260_v37  ;;  %394 = vmatpush1.msra.mxu0 %v323_v38  ;;  %v249_v59 = vld [vmem:[#allocation2 + $0x10] sm:$0xff]  ;;  %v312_v60 = vld [vmem:[%s1003_s2 + $0x8] sm:$0xff]  ;;  %v311_v62 = vld [vmem:[%s1003_s2] sm:$0xff] }
  0x30   : > { %465 = vmatpush1.msra.mxu1 %v259_v39  ;;  %395 = vmatprep.subr.mxu0 %v322_v40  ;;  %v248_v61 = vld [vmem:[#allocation2 + $0x8] sm:$0xff]  ;;  %v247_v63 = vld [vmem:[#allocation2] sm:$0xff]  ;;  %v374_v0 = vld [vmem:[%s1003_s2 + $0x1f8] sm:$0xff] }
  0x31   : > { %466 = vmatprep.subr.mxu1 %v258_v41  ;;  %396 = vmatpush1.msra.mxu0 %v321_v42  ;;  %v310_v1 = vld [vmem:[#allocation2 + $0x1f8] sm:$0xff]  ;;  %v373_v2 = vld [vmem:[%s1003_s2 + $0x1f0] sm:$0xff]  ;;  %v372_v4 = vld [vmem:[%s1003_s2 + $0x1e8] sm:$0xff] }
  0x32   : > { %467 = vmatpush1.msra.mxu1 %v257_v43  ;;  %397 = vmatprep.subr.mxu0 %v320_v44  ;;  %v309_v3 = vld [vmem:[#allocation2 + $0x1f0] sm:$0xff]  ;;  %v308_v5 = vld [vmem:[#allocation2 + $0x1e8] sm:$0xff]  ;;  %v371_v6 = vld [vmem:[%s1003_s2 + $0x1e0] sm:$0xff] }
  0x33   : > { %468 = vmatprep.subr.mxu1 %v256_v45  ;;  %398 = vmatpush1.msra.mxu0 %v319_v46  ;;  %v307_v7 = vld [vmem:[#allocation2 + $0x1e0] sm:$0xff]  ;;  %v370_v8 = vld [vmem:[%s1003_s2 + $0x1d8] sm:$0xff]  ;;  %v369_v10 = vld [vmem:[%s1003_s2 + $0x1d0] sm:$0xff] }
  0x34   : > { %469 = vmatpush1.msra.mxu1 %v255_v47  ;;  %399 = vmatprep.subr.mxu0 %v318_v48  ;;  %v306_v9 = vld [vmem:[#allocation2 + $0x1d8] sm:$0xff]  ;;  %v305_v11 = vld [vmem:[#allocation2 + $0x1d0] sm:$0xff]  ;;  %v368_v12 = vld [vmem:[%s1003_s2 + $0x1c8] sm:$0xff] }
  0x35   : > { %470 = vmatprep.subr.mxu1 %v254_v49  ;;  %400 = vmatpush1.msra.mxu0 %v317_v50  ;;  %v304_v13 = vld [vmem:[#allocation2 + $0x1c8] sm:$0xff]  ;;  %v367_v14 = vld [vmem:[%s1003_s2 + $0x1c0] sm:$0xff]  ;;  %v366_v16 = vld [vmem:[%s1003_s2 + $0x1b8] sm:$0xff] }
  0x36   : > { %471 = vmatpush1.msra.mxu1 %v253_v51  ;;  %401 = vmatprep.subr.mxu0 %v316_v52  ;;  %v303_v15 = vld [vmem:[#allocation2 + $0x1c0] sm:$0xff]  ;;  %v302_v17 = vld [vmem:[#allocation2 + $0x1b8] sm:$0xff]  ;;  %v365_v18 = vld [vmem:[%s1003_s2 + $0x1b0] sm:$0xff] }
  0x37   : > { %472 = vmatprep.subr.mxu1 %v252_v53  ;;  %402 = vmatpush1.msra.mxu0 %v315_v54  ;;  %v301_v19 = vld [vmem:[#allocation2 + $0x1b0] sm:$0xff]  ;;  %v364_v20 = vld [vmem:[%s1003_s2 + $0x1a8] sm:$0xff]  ;;  %v363_v22 = vld [vmem:[%s1003_s2 + $0x1a0] sm:$0xff] }
  0x38   : > { %473 = vmatpush1.msra.mxu1 %v251_v55  ;;  %403 = vmatprep.subr.mxu0 %v314_v56  ;;  %v300_v21 = vld [vmem:[#allocation2 + $0x1a8] sm:$0xff]  ;;  %v299_v23 = vld [vmem:[#allocation2 + $0x1a0] sm:$0xff]  ;;  %v362_v24 = vld [vmem:[%s1003_s2 + $0x198] sm:$0xff] }
  0x39   : > { %474 = vmatprep.subr.mxu1 %v250_v57  ;;  %404 = vmatpush1.msra.mxu0 %v313_v58  ;;  %v298_v25 = vld [vmem:[#allocation2 + $0x198] sm:$0xff]  ;;  %v361_v26 = vld [vmem:[%s1003_s2 + $0x190] sm:$0xff]  ;;  %v916_v27 = vld [vmem:[%s207_s14 + $0x8] sm:$0xff] }
  0x3a   : > { %475 = vmatpush1.msra.mxu1 %v249_v59  ;;  %405 = vmatprep.subr.mxu0 %v312_v60  ;;  %v918_v28 = vld [vmem:[%s207_s14 + $0x18] sm:$0xff]  ;;  %v297_v29 = vld [vmem:[#allocation2 + $0x190] sm:$0xff]  ;;  %v924_v32 = vld [vmem:[%s207_s14] sm:$0xff] }
  0x3b   : > { %476 = vmatprep.subr.mxu1 %v248_v61  ;;  %406 = vmatpush1.msra.mxu0 %v311_v62  ;;  %v238_v30 = vadd.f32 %v918_v28, %v916_v27  ;;  %v224_v31 = vmax.f32 %v916_v27, %v918_v28  ;;  %v926_v33 = vld [vmem:[%s207_s14 + $0x10] sm:$0xff]  ;;  %v360_v34 = vld [vmem:[%s1003_s2 + $0x188] sm:$0xff]  ;;  %v359_v38 = vld [vmem:[%s1003_s2 + $0x180] sm:$0xff] }
  0x3c   : > { %477 = vmatpush1.msra.mxu1 %v247_v63  ;;  %407 = vmatprep.subr.mxu0 %v374_v0  ;;  %v296_v35 = vld [vmem:[#allocation2 + $0x188] sm:$0xff]  ;;  %v231_v36 = vadd.f32 %v926_v33, %v924_v32  ;;  %v217_v37 = vmax.f32 %v924_v32, %v926_v33  ;;  %v295_v39 = vld [vmem:[#allocation2 + $0x180] sm:$0xff]  ;;  %v358_v42 = vld [vmem:[%s1003_s2 + $0x178] sm:$0xff] }
  0x3d   : > { %478 = vmatprep.subr.mxu1 %v310_v1  ;;  %408 = vmatpush2.msra.mxu0 %v373_v2  ;;  %v239_v40 = vrot.slane %v238_v30, 4  ;;  %v225_v41 = vrot.slane %v224_v31, 4  ;;  %v294_v43 = vld [vmem:[#allocation2 + $0x178] sm:$0xff]  ;;  %v357_v46 = vld [vmem:[%s1003_s2 + $0x170] sm:$0xff]  ;;  %v356_v50 = vld [vmem:[%s1003_s2 + $0x168] sm:$0xff] }
  0x3e   : > { %479 = vmatpush2.msra.mxu1 %v309_v3  ;;  %409 = vmatprep.subr.mxu0 %v372_v4  ;;  %v232_v44 = vrot.slane %v231_v36, 4  ;;  %v218_v45 = vrot.slane %v217_v37, 4  ;;  %v293_v47 = vld [vmem:[#allocation2 + $0x170] sm:$0xff]  ;;  %v292_v51 = vld [vmem:[#allocation2 + $0x168] sm:$0xff]  ;;  %v355_v54 = vld [vmem:[%s1003_s2 + $0x160] sm:$0xff] }
  0x3f   : > { %480 = vmatprep.subr.mxu1 %v308_v5  ;;  %410 = vmatpush2.msra.mxu0 %v371_v6  ;;  %v240_v48 = vadd.f32 %v239_v40, %v238_v30  ;;  %v226_v49 = vmax.f32 %v224_v31, %v225_v41  ;;  %v291_v55 = vld [vmem:[#allocation2 + $0x160] sm:$0xff]  ;;  %v354_v58 = vld [vmem:[%s1003_s2 + $0x158] sm:$0xff]  ;;  %v353_v62 = vld [vmem:[%s1003_s2 + $0x150] sm:$0xff] }
  0x40   : > { %481 = vmatpush2.msra.mxu1 %v307_v7  ;;  %411 = vmatprep.subr.mxu0 %v370_v8  ;;  %v233_v52 = vadd.f32 %v232_v44, %v231_v36  ;;  %v219_v53 = vmax.f32 %v217_v37, %v218_v45  ;;  %v290_v59 = vld [vmem:[#allocation2 + $0x158] sm:$0xff]  ;;  %v289_v63 = vld [vmem:[#allocation2 + $0x150] sm:$0xff]  ;;  %v352_v1 = vld [vmem:[%s1003_s2 + $0x148] sm:$0xff] }
  0x41   : > { %482 = vmatprep.subr.mxu1 %v306_v9  ;;  %412 = vmatpush2.msra.mxu0 %v369_v10  ;;  %v241_v56 = vrot.slane %v240_v48, 2  ;;  %v227_v57 = vrot.slane %v226_v49, 2  ;;  %v288_v2 = vld [vmem:[#allocation2 + $0x148] sm:$0xff]  ;;  %v351_v4 = vld [vmem:[%s1003_s2 + $0x140] sm:$0xff]  ;;  %v350_v8 = vld [vmem:[%s1003_s2 + $0x138] sm:$0xff] }
  0x42   : > { %483 = vmatpush2.msra.mxu1 %v305_v11  ;;  %413 = vmatprep.subr.mxu0 %v368_v12  ;;  %v234_v60 = vrot.slane %v233_v52, 2  ;;  %v220_v61 = vrot.slane %v219_v53, 2  ;;  %v287_v5 = vld [vmem:[#allocation2 + $0x140] sm:$0xff]  ;;  %v286_v9 = vld [vmem:[#allocation2 + $0x138] sm:$0xff]  ;;  %v349_v12 = vld [vmem:[%s1003_s2 + $0x130] sm:$0xff] }
  0x43   : > { %484 = vmatprep.subr.mxu1 %v304_v13  ;;  %414 = vmatpush2.msra.mxu0 %v367_v14  ;;  %v242_v0 = vadd.f32 %v241_v56, %v240_v48  ;;  %v228_v7 = vmax.f32 %v226_v49, %v227_v57  ;;  %v285_v13 = vld [vmem:[#allocation2 + $0x130] sm:$0xff]  ;;  %v348_v14 = vld [vmem:[%s1003_s2 + $0x128] sm:$0xff]  ;;  %v343_v31 = vld [vmem:[%s1003_s2 + $0x100] sm:$0xff] }
  0x44   : > { %485 = vmatpush2.msra.mxu1 %v303_v15  ;;  %415 = vmatprep.subr.mxu0 %v366_v16  ;;  %v235_v3 = vadd.f32 %v234_v60, %v233_v52  ;;  %v221_v11 = vmax.f32 %v219_v53, %v220_v61  ;;  %v284_v15 = vld [vmem:[#allocation2 + $0x128] sm:$0xff]  ;;  %v517_v41 = vld [vmem:[%s1004_s3] sm:$0x3] }
  0x45   : > { %486 = vmatprep.subr.mxu1 %v302_v17  ;;  %416 = vmatpush2.msra.mxu0 %v365_v18  ;;  %v243_v6 = vrot.slane %v242_v0, 1  ;;  %v347_v17 = vld [vmem:[%s1003_s2 + $0x120] sm:$0xff] }
  0x46   : > { %487 = vmatpush2.msra.mxu1 %v301_v19  ;;  %417 = vmatprep.subr.mxu0 %v364_v20  ;;  %v236_v10 = vrot.slane %v235_v3, 1  ;;  %v283_v18 = vld [vmem:[#allocation2 + $0x120] sm:$0xff]  ;;  %v229_v19 = vrot.slane %v228_v7, 1  ;;  %v346_v20 = vld [vmem:[%s1003_s2 + $0x118] sm:$0xff] }
  0x47   : > { %488 = vmatprep.subr.mxu1 %v300_v21  ;;  %418 = vmatpush2.msra.mxu0 %v363_v22  ;;  %v244_v16 = vadd.f32 %v243_v6, %v242_v0  ;;  %v282_v21 = vld [vmem:[#allocation2 + $0x118] sm:$0xff] }
  0x48   : > { %489 = vmatpush2.msra.mxu1 %v299_v23  ;;  %419 = vmatprep.subr.mxu0 %v362_v24  ;;  %v237_v22 = vadd.f32 %v236_v10, %v235_v3  ;;  %v222_v23 = vrot.slane %v221_v11, 1  ;;  %v345_v24 = vld [vmem:[%s1003_s2 + $0x110] sm:$0xff] }
  0x49   : > { %490 = vmatprep.subr.mxu1 %v298_v25  ;;  %420 = vmatpush2.msra.mxu0 %v361_v26  ;;  %v281_v25 = vld [vmem:[#allocation2 + $0x110] sm:$0xff]  ;;  %v344_v26 = vld [vmem:[%s1003_s2 + $0x108] sm:$0xff]  ;;  %v246_v30 = vmul.f32 0.0625, %v244_v16 }
  0x4a   : > { %491 = vmatpush2.msra.mxu1 %v297_v29  ;;  %421 = vmatprep.subr.mxu0 %v360_v34  ;;  %v280_v29 = vld [vmem:[#allocation2 + $0x108] sm:$0xff]  ;;  %v230_v34 = vmax.f32 %v228_v7, %v229_v19  ;;  %v245_v36 = vmul.f32 0.0625, %v237_v22  ;;  %v223_v37 = vmax.f32 %v221_v11, %v222_v23 }
  0x4b   : > { %492 = vmatprep.subr.mxu1 %v296_v35  ;;  %422 = vmatpush2.msra.mxu0 %v359_v38  ;;  %v279_v35 = vld [vmem:[#allocation2 + $0x100] sm:$0xff]  ;;  %v519_v38 = vlaneseq }
  0x4c   : > { %493 = vmatpush2.msra.mxu1 %v295_v39  ;;  %423 = vmatprep.subr.mxu0 %v358_v42 }
  0x4d   : > { %494 = vmatprep.subr.mxu1 %v294_v43  ;;  %424 = vmatpush2.msra.mxu0 %v357_v46  ;;  %v520_v39 = vshrl.u32 %v519_v38, 7 }
  0x4e   : > { %495 = vmatpush2.msra.mxu1 %v293_v47  ;;  %425 = vmatprep.subr.mxu0 %v356_v50 }
  0x4f   : > { %496 = vmatprep.subr.mxu1 %v292_v51  ;;  %426 = vmatpush2.msra.mxu0 %v355_v54  ;;  %v521_v40 = vsub.s32 0, %v520_v39  ;;  %v525_v42 = vsub.s32 1, %v520_v39 }
  0x50   : > { %497 = vmatpush2.msra.mxu1 %v291_v55  ;;  %427 = vmatprep.subr.mxu0 %v354_v58 }
  0x51   : > { %498 = vmatprep.subr.mxu1 %v290_v59  ;;  %428 = vmatpush2.msra.mxu0 %v353_v62  ;;  %v522_v43 = vrot.slane %v517_v41, %v521_v40  ;;  %v526_v47 = vrot.slane %v517_v41, %v525_v42 }
  0x52   : > { %499 = vmatpush2.msra.mxu1 %v289_v63  ;;  %429 = vmatprep.subr.mxu0 %v352_v1 }
  0x53   : > { %500 = vmatprep.subr.mxu1 %v288_v2  ;;  %430 = vmatpush2.msra.mxu0 %v351_v4 }
  0x54   : > { %501 = vmatpush2.msra.mxu1 %v287_v5  ;;  %431 = vmatprep.subr.mxu0 %v350_v8 }
  0x55   : > { %502 = vmatprep.subr.mxu1 %v286_v9  ;;  %432 = vmatpush2.msra.mxu0 %v349_v12 }
  0x56   : > { %503 = vmatpush2.msra.mxu1 %v285_v13  ;;  %433 = vmatprep.subr.mxu0 %v348_v14 }
  0x57   : > { %504 = vmatprep.subr.mxu1 %v284_v15  ;;  %434 = vmatpush2.msra.mxu0 %v347_v17 }
  0x58   : > { %505 = vmatpush2.msra.mxu1 %v283_v18  ;;  %435 = vmatprep.subr.mxu0 %v346_v20 }
  0x59   : > { %506 = vmatprep.subr.mxu1 %v282_v21  ;;  %436 = vmatpush2.msra.mxu0 %v345_v24 }
  0x5a   : > { %507 = vmatpush2.msra.mxu1 %v281_v25  ;;  %437 = vmatprep.subr.mxu0 %v344_v26 }
  0x5b   : > { %508 = vmatprep.subr.mxu1 %v280_v29  ;;  %438 = vmatpush2.msra.mxu0 %v343_v31 }
  0x5c   : > { %439 = vmatprep.mubr.f32.mxu0 %v246_v30  ;;  %509 = vmatpush2.msra.mxu1 %v279_v35 }
  0x5d   : > { %510 = vmatprep.mubr.f32.mxu1 %v230_v34  ;;  %440 = vmatmul.mubr.f32.vlgmr.msra.gmra.mxu0 %v245_v36 }
  0x5e   : > { %511 = vmatmul.mubr.f32.vlgmr.msra.gmra.mxu1 %v223_v37 }
 0x11d   : > { %v441_v44 = vpop.f32.mrf.mxu0 }
 0x11e   : > { %v512_v45 = vpop.f32.mrf.mxu1 }
 0x11f   : > { %v513_v46 = vadd.f32 %v512_v45, %v441_v44  ;;  %v443_v48 = vpop.f32.mrf.mxu0 }
 0x120   : > { %v514_v49 = vpop.f32.mrf.mxu1 }
 0x121   : > { %v529_v50 = vadd.f32 %v522_v43, %v513_v46  ;;  %v515_v51 = vadd.f32 %v514_v49, %v443_v48 }
 0x123   : > { %v637_v52 = vmul.f32 -1.442695, %v529_v50  ;;  %v530_v53 = vadd.f32 %v526_v47, %v515_v51 }
 0x125   : > { %664 = vpow2.f32 %v637_v52  ;;  %v638_v54 = vmul.f32 -1.442695, %v530_v53 }
 0x127   : > { %666 = vpow2.f32 %v638_v54 }
 0x132   : > { %v665_v55 = vpop.eup %664 }
 0x133   : > { %v537_v56 = vadd.f32 1.0, %v665_v55 }
 0x134   : > { %v667_v57 = vpop.eup %666 }
 0x135   : > { %668 = vrcp.f32 %v537_v56  ;;  %v538_v58 = vadd.f32 1.0, %v667_v57 }
 0x137   : > { %670 = vrcp.f32 %v538_v58 }
 0x142   : > { %v669_v59 = vpop.eup %668 }
 0x143   : > { %v546_v60 = vrot.slane %v669_v59, %v521_v40 }
 0x144   : > { %v671_v61 = vpop.eup %670 }
 0x145   : > { %v551_v62 = vmul.f32 %v546_v60, %v924_v32  ;;  %v553_v63 = vmul.f32 %v546_v60, %v926_v33  ;;  %v550_v0 = vrot.slane %v671_v61, %v521_v40 }
 0x147   : > { %555 = vst [vmem:[%s212_s19] sm:$0xff] %v551_v62  ;;  %557 = vst [vmem:[%s212_s19 + $0x10] sm:$0xff] %v553_v63  ;;  %v552_v1 = vmul.f32 %v550_v0, %v916_v27  ;;  %v554_v2 = vmul.f32 %v550_v0, %v918_v28 }
 0x149   : > { %556 = vst [vmem:[%s212_s19 + $0x8] sm:$0xff] %v552_v1  ;;  %558 = vst [vmem:[%s212_s19 + $0x18] sm:$0xff] %v554_v2 }
 0x14a PF: > { %s15_s15 = sadd.s32 1, %s708_s15  }
 0x14b   : > { %p12_p1 = scmp.ge.s32.totalorder %s15_s15, 4  }
 0x14d   :  { %14 = sbr.rel (!%p12_p1) target bundleno = 1 (0x1), region = 71 }
 0x152   :  { %580 = vsyncpa [#allocation3], 1 }
 0x153   :  { %582 = vsyncpa [#allocation3 + $0x1], 1 }

</bundles_post_ra>
